<compile_context>
chip_gen: v5e
topology: v5e:2x2
jax: 0.10.0
libtpu: 0.0.40
codegen_flags: <defaults>
</compile_context>

<pallas_src>
import functools

import jax
import jax.numpy as jnp
import numpy as np
from jax.experimental import pallas as pl
from jax.experimental.pallas import tpu as pltpu

_LEAKY_SLOPE = 0.2
_MASK_VALUE = -1e30    # finite "minus infinity": exp underflows to exactly 0.0


# ---------------------------------------------------------------------------
# Kernel 1: node-feature projections (row tiled; concatenated weights resident).
# Produces [g_l | g_r | el*c1 | er*c1] in one MXU dot.
# ---------------------------------------------------------------------------
def _proj_kernel(h_ref, w_ref, out_ref):
    # At Din=16 an f32 dot is plenty; cast h/w to bf16 here for v6e/v7x MXU
    # speed once Din / H*F grow (keep preferred_element_type=f32).
    out_ref[...] = jnp.dot(h_ref[...], w_ref[...],
                           preferred_element_type=jnp.float32)


# ---------------------------------------------------------------------------
# Kernel 2: masked GATv2 attention for one destination row tile, all heads.
# ---------------------------------------------------------------------------
def _attn_kernel(col_strip, mxu_bf16, glT_ref, gr_ref, elT_ref, erc_ref,
                 attn_ref, mask_ref, out_ref):
    """
    glT_ref : [H, F, N]  g_l^T per head (source nodes on lanes)
    gr_ref  : [H, N, F]  g_r per head (all sources; dest rows sliced from it)
    elT_ref : [H, N]     c1 * (g_l . attn) per head, source nodes on lanes
    erc_ref : [N, H]     c1 * (g_r . attn) per head, nodes on sublanes
    attn_ref: [F]  SMEM  c2 * attn vector (for the |z| term)
    mask_ref: [T, N]     int8 adjacency block for this tile (shared by heads)
    out_ref : [T, H*F]   output rows for this destination tile
    """
    n_heads, n_hidden, n_nodes = glT_ref.shape
    row_tile = out_ref.shape[0]
    n_strips = n_nodes // col_strip
    row_start = pl.multiple_of(pl.program_id(0) * row_tile, row_tile)

    agg_dtype = jnp.bfloat16 if mxu_bf16 else jnp.float32

    head_outs = []
    for hd in range(n_heads):
        glT_h = glT_ref[hd]                                     # [F, N]
        gr_dst = gr_ref[hd, pl.ds(row_start, row_tile), :]      # [T, F]
        el_h = elT_ref[hd:hd + 1, :]                            # [1, N]
        er_h = erc_ref[pl.ds(row_start, row_tile), hd:hd + 1]   # [T, 1]

        # e[t, j] = c1*(el[j] + er[t]) + sum_f (c2*attn[f]) * |g_l[j,f]+g_r[t,f]|
        # built in 128-lane neighbour strips to bound live vregs.
        strips = []
        for s in range(n_strips):
            c0 = s * col_strip
            acc = el_h[:, c0:c0 + col_strip] + er_h             # [T, CS]
            for f in range(n_hidden):
                zf = glT_h[f:f + 1, c0:c0 + col_strip] + gr_dst[:, f:f + 1]
                acc = acc + attn_ref[f] * jnp.abs(zf)           # add, abs, mul-add
            strips.append(acc)
        e = strips[0] if n_strips == 1 else jnp.concatenate(strips, axis=1)

        # Mask non-edges with a large finite negative bias (int8 compare, no
        # convert).  NOTE: a row with no edges yields uniform attention here,
        # where the reference softmax over all -inf would produce NaN.
        e = jnp.where(mask_ref[...] != 0, e, _MASK_VALUE)

        # Softmax over the neighbour (lane) axis; normalization is applied to
        # the tiny [T, F] aggregation result, not the [T, N] probabilities.
        m = jnp.max(e, axis=1, keepdims=True)                   # [T, 1]
        p = jnp.exp(e - m)                                      # [T, N]; masked -> 0
        denom = jnp.sum(p, axis=1, keepdims=True)               # [T, 1]

        # TODO(synk): dropout on the attention is identity at module default p=0.0.
        out_h = jnp.dot(p.astype(agg_dtype), gr_ref[hd].astype(agg_dtype),
                        preferred_element_type=jnp.float32)     # [T, F]
        head_outs.append(out_h / denom)                         # exact normalize

    full = head_outs[0] if n_heads == 1 else jnp.concatenate(head_outs, axis=1)
    out_ref[...] = full.astype(out_ref.dtype)                   # one [T, H*F] store


# ---------------------------------------------------------------------------
# Wrapper
# ---------------------------------------------------------------------------
def gat_v2_forward(h, w_l, w_r, attn_w, adj, *, n_heads, n_hidden,
                   is_concat=True, negative_slope=_LEAKY_SLOPE, row_tile=None,
                   mxu_bf16=False):
    """GATv2 forward.

    h       : [N, Din]   node features
    w_l/w_r : [Din, H*F] linear_l / linear_r weights (pass w_r = w_l to mimic
              share_weights=True)
    attn_w  : [1, F]     attn vector
    adj     : [N, N]     adjacency (nonzero == edge); heads share it, matching
              extend_adjacency_matrix's broadcast.
    mxu_bf16: cast MXU operands to bf16 (recommended on v6e/v7x once shapes grow).
    """
    n_nodes, in_features = h.shape
    hf = n_heads * n_hidden
    assert w_l.shape == (in_features, hf) and w_r.shape == (in_features, hf)

    if row_tile is None:
        row_tile = 128 if n_nodes % 128 == 0 else n_nodes
    assert n_nodes % row_tile == 0
    if row_tile != n_nodes:
        assert row_tile % 32 == 0        # int8 mask sublane packing
    n_row_tiles = n_nodes // row_tile
    col_strip = 128 if n_nodes % 128 == 0 else n_nodes

    c1 = 0.5 * (1.0 + negative_slope)
    c2 = 0.5 * (1.0 - negative_slope)
    attn_vec = attn_w.reshape(n_hidden).astype(jnp.float32)

    # --- one-time weight folding: [W_l | W_r | c1*W_l@attn | c1*W_r@attn] ----
    wl3 = w_l.reshape(in_features, n_heads, n_hidden)
    wr3 = w_r.reshape(in_features, n_heads, n_hidden)
    w_el = c1 * jnp.einsum('dhf,f->dh', wl3, attn_vec)          # [Din, H]
    w_er = c1 * jnp.einsum('dhf,f->dh', wr3, attn_vec)          # [Din, H]
    w_aug = jnp.concatenate([w_l, w_r, w_el, w_er], axis=1).astype(jnp.float32)
    w_tot = 2 * hf + 2 * n_heads

    # ---- projections: one MXU kernel, weights resident, row-tiled ----------
    g_all = pl.pallas_call(
        _proj_kernel,
        out_shape=jax.ShapeDtypeStruct((n_nodes, w_tot), jnp.float32),
        grid=(n_row_tiles,),
        in_specs=[
            pl.BlockSpec((row_tile, in_features), lambda i: (i, 0)),
            pl.BlockSpec((in_features, w_tot), lambda i: (0, 0)),
        ],
        out_specs=pl.BlockSpec((row_tile, w_tot), lambda i: (i, 0)),
        compiler_params=pltpu.CompilerParams(dimension_semantics=("parallel",)),
    )(h.astype(jnp.float32), w_aug)

    # ---- one-time layout plumbing (outside the hot kernel) -----------------
    g_l = g_all[:, :hf]
    g_r = g_all[:, hf:2 * hf]
    elc = g_all[:, 2 * hf:2 * hf + n_heads]                     # [N, H]
    erc = g_all[:, 2 * hf + n_heads:]                           # [N, H]

    glT = jnp.transpose(g_l.reshape(n_nodes, n_heads, n_hidden), (1, 2, 0))  # [H,F,N]
    gr3 = jnp.transpose(g_r.reshape(n_nodes, n_heads, n_hidden), (1, 0, 2))  # [H,N,F]
    elT = jnp.transpose(elc, (1, 0))                                          # [H,N]
    mask = (adj != 0).astype(jnp.int8)                                        # [N,N]
    attn_c2 = (c2 * attn_vec).astype(jnp.float32)

    # ---- attention: grid over destination row tiles, heads fused in-kernel --
    out = pl.pallas_call(
        functools.partial(_attn_kernel, col_strip, mxu_bf16),
        out_shape=jax.ShapeDtypeStruct((n_nodes, hf), jnp.float32),
        grid=(n_row_tiles,),
        in_specs=[
            pl.BlockSpec((n_heads, n_hidden, n_nodes), lambda i: (0, 0, 0)),  # g_l^T
            pl.BlockSpec((n_heads, n_nodes, n_hidden), lambda i: (0, 0, 0)),  # g_r
            pl.BlockSpec((n_heads, n_nodes), lambda i: (0, 0)),               # c1*el
            pl.BlockSpec((n_nodes, n_heads), lambda i: (0, 0)),               # c1*er
            pl.BlockSpec(memory_space=pltpu.MemorySpace.SMEM),                # c2*attn
            pl.BlockSpec((row_tile, n_nodes), lambda i: (i, 0)),              # int8 mask
        ],
        out_specs=pl.BlockSpec((row_tile, hf), lambda i: (i, 0)),
        compiler_params=pltpu.CompilerParams(dimension_semantics=("parallel",)),
    )(glT, gr3, elT, erc, attn_c2, mask)

    if is_concat:
        return out                                              # already [N, H*F]
    return jnp.mean(out.reshape(n_nodes, n_heads, n_hidden), axis=1)


# ---------------------------------------------------------------------------
# Pure-JAX reference mirroring the PyTorch forward exactly.
# ---------------------------------------------------------------------------
def gat_v2_reference(h, w_l, w_r, attn_w, adj, *, n_heads, n_hidden,
                     is_concat=True, negative_slope=_LEAKY_SLOPE):
    n = h.shape[0]
    hi = jax.lax.Precision.HIGHEST
    g_l = jnp.dot(h, w_l, precision=hi).reshape(n, n_heads, n_hidden)
    g_r = jnp.dot(h, w_r, precision=hi).reshape(n, n_heads, n_hidden)
    g_sum = g_l[None, :, :, :] + g_r[:, None, :, :]             # [N, N, H, F]
    act = jnp.where(g_sum >= 0, g_sum, negative_slope * g_sum)
    e = jnp.einsum('ijhf,f->ijh', act, attn_w.reshape(-1), precision=hi)
    adj_ext = jnp.broadcast_to((adj != 0)[:, :, None], e.shape)  # extend_adjacency_matrix
    e = jnp.where(adj_ext, e, -jnp.inf)
    a = jax.nn.softmax(e, axis=1)
    attn_res = jnp.einsum('ijh,jhf->ihf', a, g_r, precision=hi)
    if is_concat:
        return attn_res.reshape(n, n_heads * n_hidden)
    return attn_res.mean(axis=1)


if __name__ == "__main__":
    # Module config: GraphAttentionV2Layer(in_features=16, out_features=32,
    # adj, n_heads=4, is_concat=True)  ->  n_hidden = 8.
    n_nodes, in_features, out_features, n_heads = 256, 16, 32, 4
    n_hidden = out_features // n_heads

    key = jax.random.PRNGKey(0)
    k_h, k_wl, k_wr, k_attn, k_adj = jax.random.split(key, 5)

    h = jax.random.normal(k_h, (n_nodes, in_features), dtype=jnp.float32)

    # nn.Linear(in, out, bias=False) default init: U(-1/sqrt(in), 1/sqrt(in)).
    bound_lin = 1.0 / np.sqrt(in_features)
    w_l = jax.random.uniform(k_wl, (in_features, n_heads * n_hidden),
                             minval=-bound_lin, maxval=bound_lin, dtype=jnp.float32)
    w_r = jax.random.uniform(k_wr, (in_features, n_heads * n_hidden),
                             minval=-bound_lin, maxval=bound_lin, dtype=jnp.float32)
    bound_attn = 1.0 / np.sqrt(n_hidden)
    attn_w = jax.random.uniform(k_attn, (1, n_hidden),
                                minval=-bound_attn, maxval=bound_attn, dtype=jnp.float32)

    # Sparse-ish 0/1 adjacency with self loops (heads share the same mask).
    adj = (jax.random.uniform(k_adj, (n_nodes, n_nodes)) > 0.9).astype(jnp.float32)
    adj = jnp.maximum(adj, jnp.eye(n_nodes, dtype=jnp.float32))

    # concat path (is_concat=True, out_features = n_heads * n_hidden)
    out_c = gat_v2_forward(h, w_l, w_r, attn_w, adj,
                           n_heads=n_heads, n_hidden=n_hidden, is_concat=True)
    out_c = jax.block_until_ready(out_c)
    ref_c = gat_v2_reference(h, w_l, w_r, attn_w, adj,
                             n_heads=n_heads, n_hidden=n_hidden, is_concat=True)
    assert out_c.shape == (n_nodes, out_features)
    # Remaining error is MXU default-precision f32 matmul vs HIGHEST reference
    # (the softmax normalization is now exact).
    np.testing.assert_allclose(np.asarray(out_c), np.asarray(ref_c),
                               rtol=1e-2, atol=1e-2)

    # mean path (is_concat=False; corresponds to a module with out_features == n_hidden)
    out_m = gat_v2_forward(h, w_l, w_r, attn_w, adj,
                           n_heads=n_heads, n_hidden=n_hidden, is_concat=False)
    out_m = jax.block_until_ready(out_m)
    ref_m = gat_v2_reference(h, w_l, w_r, attn_w, adj,
                             n_heads=n_heads, n_hidden=n_hidden, is_concat=False)
    assert out_m.shape == (n_nodes, n_hidden)
    np.testing.assert_allclose(np.asarray(out_m), np.asarray(ref_m),
                               rtol=1e-2, atol=1e-2)

    print("KERNEL_OK")
</pallas_src>

<mosaic_0001>
module attributes {stable_mosaic.version = 11 : i64} {
  func.func @_proj_kernel(%arg0: i32, %arg1: memref<128x16xf32, #tpu.memory_space<vmem>>, %arg2: memref<16x72xf32, #tpu.memory_space<vmem>>, %arg3: memref<128x72xf32, #tpu.memory_space<vmem>>) attributes {dimension_semantics = [#tpu.dimension_semantics<parallel>], iteration_bounds = array<i64: 2>, scalar_prefetch = 0 : i64, scratch_operands = 0 : i64, tpu.core_type = #tpu.core_type<tc>, window_params = [{transform_indices = @transform_0, window_bounds = array<i64: 128, 16>}, {pipeline_mode = #tpu.pipeline_mode<synchronous>, transform_indices = @transform_1, window_bounds = array<i64: 16, 72>}, {transform_indices = @transform_2, window_bounds = array<i64: 128, 72>}]} {
    %c0 = arith.constant 0 : index
    %c0_0 = arith.constant 0 : index
    %0 = vector.load %arg1[%c0, %c0_0] : memref<128x16xf32, #tpu.memory_space<vmem>>, vector<128x16xf32>
    %c0_1 = arith.constant 0 : index
    %c0_2 = arith.constant 0 : index
    %1 = vector.load %arg2[%c0_1, %c0_2] : memref<16x72xf32, #tpu.memory_space<vmem>>, vector<16x72xf32>
    %cst = arith.constant dense<0.000000e+00> : vector<128x72xf32>
    %2 = tpu.matmul %0, %1, %cst {dimension_numbers = #tpu.dot_dimension_numbers<[1], [0], [0], [1], [0, 0, 1, 1], [], []>} : vector<128x16xf32>, vector<16x72xf32>, vector<128x72xf32> -> vector<128x72xf32>
    %c0_3 = arith.constant 0 : index
    %c0_4 = arith.constant 0 : index
    %3 = vector.load %arg3[%c0_3, %c0_4] : memref<128x72xf32, #tpu.memory_space<vmem>>, vector<128x72xf32>
    tpu.vector_store %arg3[%c0_3, %c0_4], %2 {strides = array<i32>} : memref<128x72xf32, #tpu.memory_space<vmem>>, vector<128x72xf32>,
    return
  }
  func.func @transform_0(%arg0: i32) -> (i32, i32) {
    %c0_i32 = arith.constant 0 : i32
    %c0_i32_0 = arith.constant 0 : i32
    return %arg0, %c0_i32 : i32, i32
  }
  func.func @transform_1(%arg0: i32) -> (i32, i32) {
    %c0_i32 = arith.constant 0 : i32
    %c0_i32_0 = arith.constant 0 : i32
    %c0_i32_1 = arith.constant 0 : i32
    return %c0_i32, %c0_i32_0 : i32, i32
  }
  func.func @transform_2(%arg0: i32) -> (i32, i32) {
    %c0_i32 = arith.constant 0 : i32
    %c0_i32_0 = arith.constant 0 : i32
    return %arg0, %c0_i32 : i32, i32
  }
}

</mosaic_0001>

<bundles_post_ra>
// kernel: tpu_custom_call.1
= control target key start
LH: loop header
LB: loop body
LE: loop exit
PB: predicated region body
PF: predicated region fallthrough
CT: control target
= control target key end

     0   :  { %s416_s9 = smov 0   ;;  %s496_s0 = inlined_call_operand.vmem [shape: f32[256,16], index: 0, kind: input, shape index: {}]   ;;  %s497_s1 = inlined_call_operand.vmem [shape: f32[16,72], index: 1, kind: input, shape index: {}]   ;;  %s498_s2 = inlined_call_operand.vmem [shape: f32[256,72], index: 2, kind: output, shape index: {}]  }
   0x1 LB: > { %s352_s10 = sadd.s32 4294967295, %s399_s9   ;;  %p356_p0 = scmp.ge.s32.totalorder %s399_s9, 1  ;;  %s399_s9 = sphi %s416_s9, %s12_s9  }
   0x2   : > { %p113_p1 = scmp.lt.s32.totalorder %s399_s9, 3 }
   0x4   : > { %p114_p2 = pnand %p356_p0, %p113_p1 }
   0x5   : > { %s357_s15 = sshll.u32 (!%p114_p2), %s352_s10, 4 }
   0x6   : > { %117 = sbr.rel (%p114_p2) target bundleno = 174 (0xae), region = 28  ;;  %p136_p3 = scmp.lt.s32.totalorder (!%p114_p2), %s357_s15, 31 }
   0xb   : > { %v164_v0 = vld [vmem:[%s497_s1 + $0x8] sm:$0xff]  ;;  %v163_v1 = vld [vmem:[%s497_s1] sm:$0xff]  ;;  %s500_s15 = smov (!%p136_p3, %s357_s15), 31  ;;  %vm165_vm0 = vcmask 130048   ;;  %vm279_vm1 = vcmask 588800  }
   0xc   : > { %380 = vmatpush.msra.mxu2 %v164_v0  ;;  %381 = vmatpush.msra.mxu3 %v164_v0  ;;  %s358_s16 = sshll.u32 %s500_s15, 3 }
   0xd   : > { %228 = vmatpush.msra.mxu0 %v164_v0  ;;  %379 = vmatpush.msra.mxu1 %v164_v0  ;;  %s139_s19 = scalar_lea.vmem %s496_s0, %s358_s16  ;;  %s459_s22 = scalar_lea.vmem %s498_s2, %s358_s16 }
   0xe   : > { %383 = vmatpush.msra.mxu2 %v163_v1  ;;  %384 = vmatpush.msra.mxu3 %v163_v1  ;;  %v155_v2 = vld [vmem:[%s139_s19 + $0x40] sm:$0xff]  ;;  %v156_v6 = vld [vmem:[%s139_s19 + $0x48] sm:$0xff]  ;;  %v157_v10 = vld [vmem:[%s139_s19 + $0x50] sm:$0xff] }
   0xf   : > { %229 = vmatpush.msra.mxu0 %v163_v1  ;;  %382 = vmatpush.msra.mxu1 %v163_v1  ;;  %v159_v3 = vld [vmem:[%s139_s19 + $0x60] sm:$0xff]  ;;  %v160_v7 = vld [vmem:[%s139_s19 + $0x68] sm:$0xff]  ;;  %v161_v11 = vld [vmem:[%s139_s19 + $0x70] sm:$0xff] }
  0x10   : > { %v147_v4 = vld [vmem:[%s139_s19] sm:$0xff]  ;;  %369 = vmatmul.msk.f32.vlgmr.msra.gmra.mxu2 %vm165_vm0, %v155_v2  ;;  %373 = vmatmul.msk.f32.vlgmr.msra.gmra.mxu3 %vm165_vm0, %v159_v3  ;;  %v148_v8 = vld [vmem:[%s139_s19 + $0x8] sm:$0xff]  ;;  %v149_v12 = vld [vmem:[%s139_s19 + $0x10] sm:$0xff] }
  0x11   : > { %v151_v5 = vld [vmem:[%s139_s19 + $0x20] sm:$0xff]  ;;  %361 = vmatmul.msk.f32.vlgmr.msra.gmra.mxu0 %vm165_vm0, %v147_v4  ;;  %v152_v9 = vld [vmem:[%s139_s19 + $0x28] sm:$0xff]  ;;  %v153_v13 = vld [vmem:[%s139_s19 + $0x30] sm:$0xff] }
  0x12   : > { %365 = vmatmul.msk.f32.vlgmr.msra.gmra.mxu1 %vm165_vm0, %v151_v5  ;;  %v158_v14 = vld [vmem:[%s139_s19 + $0x58] sm:$0xff] }
  0x13   : > { %v162_v15 = vld [vmem:[%s139_s19 + $0x78] sm:$0xff] }
  0x14   : > { %v150_v16 = vld [vmem:[%s139_s19 + $0x18] sm:$0xff] }
  0x15   : > { %v154_v17 = vld [vmem:[%s139_s19 + $0x38] sm:$0xff] }
  0x18   : > { %370 = vmatmul.msk.f32.gmra.mxu2 %vm165_vm0, %v156_v6  ;;  %374 = vmatmul.msk.f32.gmra.mxu3 %vm165_vm0, %v160_v7 }
  0x19   : > { %362 = vmatmul.msk.f32.gmra.mxu0 %vm165_vm0, %v148_v8 }
  0x1a   : > { %366 = vmatmul.msk.f32.gmra.mxu1 %vm165_vm0, %v152_v9 }
  0x20   : > { %371 = vmatmul.msk.f32.gmra.mxu2 %vm165_vm0, %v157_v10  ;;  %375 = vmatmul.msk.f32.gmra.mxu3 %vm165_vm0, %v161_v11 }
  0x21   : > { %363 = vmatmul.msk.f32.gmra.mxu0 %vm165_vm0, %v149_v12 }
  0x22   : > { %367 = vmatmul.msk.f32.gmra.mxu1 %vm165_vm0, %v153_v13 }
  0x28   : > { %372 = vmatmul.msk.f32.gmra.mxu2 %vm165_vm0, %v158_v14  ;;  %376 = vmatmul.msk.f32.gmra.mxu3 %vm165_vm0, %v162_v15 }
  0x29   : > { %364 = vmatmul.msk.f32.gmra.mxu0 %vm165_vm0, %v150_v16 }
  0x2a   : > { %368 = vmatmul.msk.f32.gmra.mxu1 %vm165_vm0, %v154_v17 }
  0x8e   : > { %v231_v18 = vpop.f32.mrf.mxu0 }
  0x8f   : > { %v243_v19 = vpop.f32.mrf.mxu1  ;;  %280 = vst.msk [vmem:[%s459_s22] sm:$0xff] %vm279_vm1, %v231_v18 }
  0x90   : > { %284 = vst.msk [vmem:[%s459_s22 + $0x20] sm:$0xff] %vm279_vm1, %v243_v19 }
  0x93   : > { %v255_v20 = vpop.f32.mrf.mxu2  ;;  %v267_v21 = vpop.f32.mrf.mxu3 }
  0x94   : > { %288 = vst.msk [vmem:[%s459_s22 + $0x40] sm:$0xff] %vm279_vm1, %v255_v20 }
  0x95   : > { %292 = vst.msk [vmem:[%s459_s22 + $0x60] sm:$0xff] %vm279_vm1, %v267_v21 }
  0x96   : > { %v234_v22 = vpop.f32.mrf.mxu0 }
  0x97   : > { %v246_v23 = vpop.f32.mrf.mxu1  ;;  %281 = vst.msk [vmem:[%s459_s22 + $0x8] sm:$0xff] %vm279_vm1, %v234_v22 }
  0x98   : > { %285 = vst.msk [vmem:[%s459_s22 + $0x28] sm:$0xff] %vm279_vm1, %v246_v23 }
  0x9b   : > { %v258_v24 = vpop.f32.mrf.mxu2  ;;  %v270_v25 = vpop.f32.mrf.mxu3 }
  0x9c   : > { %289 = vst.msk [vmem:[%s459_s22 + $0x48] sm:$0xff] %vm279_vm1, %v258_v24 }
  0x9d   : > { %293 = vst.msk [vmem:[%s459_s22 + $0x68] sm:$0xff] %vm279_vm1, %v270_v25 }
  0x9e   : > { %v237_v26 = vpop.f32.mrf.mxu0 }
  0x9f   : > { %v249_v27 = vpop.f32.mrf.mxu1  ;;  %282 = vst.msk [vmem:[%s459_s22 + $0x10] sm:$0xff] %vm279_vm1, %v237_v26 }
  0xa0   : > { %286 = vst.msk [vmem:[%s459_s22 + $0x30] sm:$0xff] %vm279_vm1, %v249_v27 }
  0xa3   : > { %v261_v28 = vpop.f32.mrf.mxu2  ;;  %v273_v29 = vpop.f32.mrf.mxu3 }
  0xa4   : > { %290 = vst.msk [vmem:[%s459_s22 + $0x50] sm:$0xff] %vm279_vm1, %v261_v28 }
  0xa5   : > { %294 = vst.msk [vmem:[%s459_s22 + $0x70] sm:$0xff] %vm279_vm1, %v273_v29 }
  0xa6   : > { %v240_v30 = vpop.f32.mrf.mxu0 }
  0xa7   : > { %v252_v31 = vpop.f32.mrf.mxu1  ;;  %283 = vst.msk [vmem:[%s459_s22 + $0x18] sm:$0xff] %vm279_vm1, %v240_v30 }
  0xa8   : > { %287 = vst.msk [vmem:[%s459_s22 + $0x38] sm:$0xff] %vm279_vm1, %v252_v31 }
  0xab   : > { %v264_v32 = vpop.f32.mrf.mxu2  ;;  %v276_v33 = vpop.f32.mrf.mxu3 }
  0xac   : > { %291 = vst.msk [vmem:[%s459_s22 + $0x58] sm:$0xff] %vm279_vm1, %v264_v32 }
  0xad   : > { %295 = vst.msk [vmem:[%s459_s22 + $0x78] sm:$0xff] %vm279_vm1, %v276_v33 }
  0xae PF: > { %s12_s9 = sadd.s32 1, %s399_s9  }
  0xaf   : > { %p9_p4 = scmp.ge.s32.totalorder %s12_s9, 4  }
  0xb1   :  { %11 = sbr.rel (!%p9_p4) target bundleno = 1 (0x1), region = 58 }

</bundles_post_ra>
